<compile_context>
chip_gen: v7x
topology: tpu7x:2x2x1
jax: 0.10.0
libtpu: 0.0.40
codegen_flags: <defaults>
</compile_context>

<pallas_src>
import jax
import jax.numpy as jnp
import numpy as np
from jax import lax
from jax.experimental import pallas as pl
from jax.experimental.pallas import tpu as pltpu


# ------------------------------ helpers ------------------------------------ #

def _round_up(x, m):
    return ((x + m - 1) // m) * m


def _device_kind():
    try:
        return jax.devices()[0].device_kind.lower()
    except Exception:
        return ""


def _gen_defaults():
    """Per-TPU-generation (tile_n, vmem_limit_bytes, bf16_vpu_ok)."""
    kind = _device_kind()
    if ("v7" in kind) or ("7x" in kind):
        # v7x: 64 MiB physical VMEM -> conservative tile & scoped limit.
        return 512, 32 * 1024 * 1024, True
    if any(t in kind for t in ("v2", "v3", "v4", "v5")):
        # v5e and older: 128 MiB VMEM but no bf16 VALU -> big tile, f32 FMA.
        return 1024, 64 * 1024 * 1024, False
    if "v6" in kind:
        return 1024, 64 * 1024 * 1024, True
    # Unknown / future chip: conservative VMEM, assume bf16 VPU exists.
    return 512, 32 * 1024 * 1024, True


# ------------------------------ kernel -------------------------------------- #

def _make_kernel(*, phase, mask_mode, chunk, n_chunks):
    """Build the fused generator kernel.

    Ref order:
      pts_ref   (1, n_tile, D)                points tile  (f32 or bf16)
      plane_ref (1, D, P)                     plane matrix (f32 or bf16)
      w_ref     (P, C)                        convex weights (f32 or bf16)
      [ccv_ref  (1, C)]                       phase 0 only, concave row (f32)
      [mask_ref (1, 1|n_tile, C)]             phases 1-4, optional mask (f32)
      h2_ref    (1, n_tile, C)  output (f32)
      h3_ref    (1, n_tile, 1)  output (f32)
    """

    def kernel(*refs):
        if phase == 0:
            pts_ref, plane_ref, w_ref, ccv_ref, h2_ref, h3_ref = refs
            mask_ref = None
        elif mask_mode is not None:
            pts_ref, plane_ref, w_ref, mask_ref, h2_ref, h3_ref = refs
            ccv_ref = None
        else:
            pts_ref, plane_ref, w_ref, h2_ref, h3_ref = refs
            ccv_ref = mask_ref = None

        pm = plane_ref[0]          # (D, P)  resident for the whole tile
        w = w_ref[...]             # (P, C)  grid-invariant block
        d_dim = pm.shape[0]

        def chunk_body(c, carry):
            r0 = pl.multiple_of(c * chunk, chunk)
            pts = pts_ref[0, pl.ds(r0, chunk), :]                 # (chunk, D)

            # h1 = relu(points @ plane_m): tiny K = D contraction done as an
            # unrolled broadcast-FMA on the VPU (MXU reserved for the big
            # matmul below).  Runs in bf16 on chips with a bf16 VALU (the
            # wrapper picks the input dtype).
            acc = pts[:, 0:1] * pm[0:1, :]
            for d in range(1, d_dim):
                acc = acc + pts[:, d:d + 1] * pm[d:d + 1, :]
            h1 = jnp.maximum(acc, 0)                               # (chunk, P)
            if h1.dtype != w.dtype:
                h1 = h1.astype(w.dtype)

            # MXU matmul: bf16 inputs / f32 accumulation by default.
            h2 = jnp.dot(h1, w, preferred_element_type=jnp.float32)

            if phase == 0:
                h2 = jnp.clip(1.0 - h2, 0.0, 1.0)
                # (chunk, C) @ (C, 1) as VPU multiply + lane reduction.
                h3 = jnp.sum(h2 * ccv_ref[...], axis=-1, keepdims=True)
                h3 = jnp.clip(h3, 0.0, 1.0)
            else:
                h2m = h2
                if mask_mode == "row":
                    h2m = h2 + mask_ref[0]                          # (1, C)
                elif mask_mode == "full":
                    h2m = h2 + mask_ref[0, pl.ds(r0, chunk), :]     # (chunk, C)
                h3 = jnp.min(h2m, axis=-1, keepdims=True)

            h2_ref[0, pl.ds(r0, chunk), :] = h2
            h3_ref[0, pl.ds(r0, chunk), :] = h3
            return carry

        # Chunked so VPU FMA work of chunk i+1 overlaps MXU pushes of chunk i
        # and the live h1 intermediate stays at (chunk, P).
        lax.fori_loop(0, n_chunks, chunk_body, 0, unroll=True)

    return kernel


# ------------------------------ wrapper ------------------------------------- #

def generator_forward(points, plane_m, convex_w, concave_w, phase,
                      convex_mask=None, *, tile_n=None, chunk_n=128,
                      use_bf16_matmul=True, vmem_limit_bytes=None):
    """Pallas equivalent of generator.forward. Returns (h2, h3)."""
    f32 = jnp.float32
    points = jnp.asarray(points, f32)
    plane_m = jnp.asarray(plane_m, f32)
    convex_w = jnp.asarray(convex_w, f32)
    concave_w = jnp.asarray(concave_w, f32)

    B, N, D = points.shape
    P = plane_m.shape[-1]
    C = convex_w.shape[-1]

    tile_default, vmem_default, bf16_vpu_ok = _gen_defaults()
    if tile_n is None:
        tile_n = tile_default
    if vmem_limit_bytes is None:
        vmem_limit_bytes = vmem_default

    # Row tiling with an explicitly padded tail (never a whole-N fallback:
    # an (N, P) f32 h1 intermediate can blow past VMEM, guaranteed on v7x).
    n_tile = min(tile_n, _round_up(N, 8))
    n_pad = _round_up(N, n_tile)
    grid = (B, n_pad // n_tile)

    chunk = chunk_n if (chunk_n <= n_tile and n_tile % chunk_n == 0) else n_tile
    n_chunks = n_tile // chunk

    mm_dtype = jnp.bfloat16 if use_bf16_matmul else f32
    fma_dtype = jnp.bfloat16 if (use_bf16_matmul and bf16_vpu_ok) else f32

    if phase == 0 or phase in (3, 4):
        w = convex_w
    elif phase in (1, 2):
        w = (convex_w > 0.01).astype(f32)       # {0,1}: exact in bf16
    else:
        raise ValueError(f"unknown phase {phase}")
    w = w.astype(mm_dtype)

    pts = points.astype(fma_dtype)
    plm = plane_m.astype(fma_dtype)
    if n_pad != N:
        pts = jnp.pad(pts, ((0, 0), (0, n_pad - N), (0, 0)))

    pts_spec = pl.BlockSpec((1, n_tile, D), lambda b, n: (b, n, 0))
    plm_spec = pl.BlockSpec((1, D, P), lambda b, n: (b, 0, 0))
    # The (P, C) block is grid-invariant (DMA'd once); default double-buffering
    # is kept deliberately — total VMEM is ~8 MiB at these tiles.
    w_spec = pl.BlockSpec((P, C), lambda b, n: (0, 0))
    h2_spec = pl.BlockSpec((1, n_tile, C), lambda b, n: (b, n, 0))
    h3_spec = pl.BlockSpec((1, n_tile, 1), lambda b, n: (b, n, 0))

    out_shapes = (jax.ShapeDtypeStruct((B, n_pad, C), f32),
                  jax.ShapeDtypeStruct((B, n_pad, 1), f32))
    cparams = pltpu.CompilerParams(
        dimension_semantics=("parallel", "parallel"),
        vmem_limit_bytes=vmem_limit_bytes)

    in_specs = [pts_spec, plm_spec, w_spec]
    args = [pts, plm, w]
    mask_mode = None

    if phase == 0:
        ccv_row = concave_w.reshape(1, C)        # (C, 1) -> lane-dense row
        in_specs.append(pl.BlockSpec((1, C), lambda b, n: (0, 0)))
        args.append(ccv_row)
    elif convex_mask is not None:
        mask = jnp.asarray(convex_mask, f32)
        while mask.ndim < 3:
            mask = mask[None]
        if mask.shape[1] == 1:
            # Per-convex row mask: stream a (B, 1, C) row, broadcast in-kernel.
            mask = jnp.broadcast_to(mask, (B, 1, C))
            in_specs.append(pl.BlockSpec((1, 1, C), lambda b, n: (b, 0, 0)))
            mask_mode = "row"
        else:
            # Full per-point mask: stream it as row tiles.
            mask = jnp.broadcast_to(mask, (B, N, C))
            if n_pad != N:
                mask = jnp.pad(mask, ((0, 0), (0, n_pad - N), (0, 0)))
            in_specs.append(pl.BlockSpec((1, n_tile, C), lambda b, n: (b, n, 0)))
            mask_mode = "full"
        args.append(mask)

    kern = _make_kernel(phase=phase, mask_mode=mask_mode,
                        chunk=chunk, n_chunks=n_chunks)

    h2, h3 = pl.pallas_call(
        kern,
        out_shape=out_shapes,
        grid_spec=pltpu.PrefetchScalarGridSpec(
            num_scalar_prefetch=0, grid=grid,
            in_specs=in_specs, out_specs=[h2_spec, h3_spec]),
        compiler_params=cparams,
    )(*args)

    if n_pad != N:
        h2 = h2[:, :N]
        h3 = h3[:, :N]
    return h2, h3


# -------------------------- pure-JAX reference ------------------------------ #

def generator_ref(points, plane_m, convex_w, concave_w, phase, convex_mask=None):
    h1 = jnp.maximum(jnp.matmul(points, plane_m), 0.0)
    if phase == 0:
        h2 = jnp.clip(1.0 - jnp.matmul(h1, convex_w), 0.0, 1.0)
        h3 = jnp.clip(jnp.matmul(h2, concave_w), 0.0, 1.0)
        return h2, h3
    w = (convex_w > 0.01).astype(jnp.float32) if phase in (1, 2) else convex_w
    h2 = jnp.matmul(h1, w)
    h2m = h2 if convex_mask is None else h2 + convex_mask
    h3 = jnp.min(h2m, axis=2, keepdims=True)
    return h2, h3


# ------------------------------- main --------------------------------------- #

if __name__ == "__main__":
    B, N, D = 2, 8, 4        # batch, num points, point dim (homogeneous coords)
    P, C = 32, 16            # p_dim (planes), c_dim (convexes)

    key = jax.random.PRNGKey(0)
    k_pts, k_plm, k_cvx, k_ccv, k_msk = jax.random.split(key, 5)

    points = jax.random.normal(k_pts, (B, N, D), jnp.float32)
    plane_m = jax.random.normal(k_plm, (B, D, P), jnp.float32)
    # deterministic param init matching nn.init.normal_ in __init__
    convex_w = 0.02 * jax.random.normal(k_cvx, (P, C), jnp.float32)
    concave_w = 1e-05 + 0.02 * jax.random.normal(k_ccv, (C, 1), jnp.float32)
    mask_row = (jax.random.uniform(k_msk, (B, 1, C)) > 0.5).astype(jnp.float32)
    mask_full = jnp.broadcast_to(mask_row, (B, N, C))

    # (phase, mask, use_bf16_matmul, tolerance). bf16 MXU (the production
    # default) is checked against the f32 reference at loosened tolerance;
    # the exact f32 path is also verified at tight tolerance.
    cases = [
        (0, None, True, 5e-2),
        (1, None, True, 5e-2),
        (2, mask_row, True, 5e-2),
        (3, mask_full, True, 5e-2),
        (4, None, True, 5e-2),
        (0, None, False, 1e-5),
        (3, mask_row, False, 1e-5),
    ]

    ok = True
    for phase, mask, bf16, tol in cases:
        h2, h3 = generator_forward(points, plane_m, convex_w, concave_w, phase,
                                   convex_mask=mask, use_bf16_matmul=bf16)
        jax.block_until_ready((h2, h3))
        h2_r, h3_r = generator_ref(points, plane_m, convex_w, concave_w, phase,
                                   convex_mask=mask)
        ok &= h2.shape == h2_r.shape and h3.shape == h3_r.shape
        ok &= bool(np.allclose(np.asarray(h2), np.asarray(h2_r),
                               rtol=tol, atol=tol))
        ok &= bool(np.allclose(np.asarray(h3), np.asarray(h3_r),
                               rtol=tol, atol=tol))

    print("KERNEL_OK" if ok else "KERNEL_MISMATCH")
</pallas_src>

<mosaic_0001>
module attributes {stable_mosaic.version = 11 : i64} {
  func.func @kernel(%arg0: i32, %arg1: i32, %arg2: memref<1x8x4xbf16, #tpu.memory_space<vmem>>, %arg3: memref<1x4x32xbf16, #tpu.memory_space<vmem>>, %arg4: memref<32x16xbf16, #tpu.memory_space<vmem>>, %arg5: memref<1x16xf32, #tpu.memory_space<vmem>>, %arg6: memref<1x8x16xf32, #tpu.memory_space<vmem>>, %arg7: memref<1x8x1xf32, #tpu.memory_space<vmem>>) attributes {dimension_semantics = [#tpu.dimension_semantics<parallel>, #tpu.dimension_semantics<parallel>], iteration_bounds = array<i64: 2, 1>, scalar_prefetch = 0 : i64, scratch_operands = 0 : i64, tpu.core_type = #tpu.core_type<tc>, window_params = [{transform_indices = @transform_0, window_bounds = array<i64: 1, 8, 4>}, {transform_indices = @transform_1, window_bounds = array<i64: 1, 4, 32>}, {pipeline_mode = #tpu.pipeline_mode<synchronous>, transform_indices = @transform_2, window_bounds = array<i64: 32, 16>}, {pipeline_mode = #tpu.pipeline_mode<synchronous>, transform_indices = @transform_3, window_bounds = array<i64: 1, 16>}, {transform_indices = @transform_4, window_bounds = array<i64: 1, 8, 16>}, {transform_indices = @transform_5, window_bounds = array<i64: 1, 8, 1>}]} {
    %c0 = arith.constant 0 : index
    %c0_0 = arith.constant 0 : index
    %c0_1 = arith.constant 0 : index
    %0 = vector.load %arg3[%c0, %c0_0, %c0_1] : memref<1x4x32xbf16, #tpu.memory_space<vmem>>, vector<1x4x32xbf16>
    %1 = vector.shape_cast %0 : vector<1x4x32xbf16> to vector<4x32xbf16>
    %c0_2 = arith.constant 0 : index
    %c0_3 = arith.constant 0 : index
    %2 = vector.load %arg4[%c0_2, %c0_3] : memref<32x16xbf16, #tpu.memory_space<vmem>>, vector<32x16xbf16>
    %c0_i32 = arith.constant 0 : i32
    %c8_i32 = arith.constant 8 : i32
    %3 = arith.muli %c0_i32, %c8_i32 : i32
    %4 = tpu.assume_multiple %3, 8 : i32
    %c0_4 = arith.constant 0 : index
    %5 = arith.index_cast %4 : i32 to index
    %c0_5 = arith.constant 0 : index
    %6 = vector.load %arg2[%c0_4, %5, %c0_5] : memref<1x8x4xbf16, #tpu.memory_space<vmem>>, vector<1x8x4xbf16>
    %7 = vector.shape_cast %6 : vector<1x8x4xbf16> to vector<8x4xbf16>
    %8 = vector.extract_strided_slice %7 {offsets = [0, 0], sizes = [8, 1], strides = [1, 1]} : vector<8x4xbf16> to vector<8x1xbf16>
    %9 = vector.extract_strided_slice %1 {offsets = [0, 0], sizes = [1, 32], strides = [1, 1]} : vector<4x32xbf16> to vector<1x32xbf16>
    %10 = vector.broadcast %8 : vector<8x1xbf16> to vector<8x32xbf16>
    %11 = vector.broadcast %9 : vector<1x32xbf16> to vector<8x32xbf16>
    %12 = arith.mulf %10, %11 : vector<8x32xbf16>
    %13 = vector.extract_strided_slice %7 {offsets = [0, 1], sizes = [8, 1], strides = [1, 1]} : vector<8x4xbf16> to vector<8x1xbf16>
    %14 = vector.extract_strided_slice %1 {offsets = [1, 0], sizes = [1, 32], strides = [1, 1]} : vector<4x32xbf16> to vector<1x32xbf16>
    %15 = vector.broadcast %13 : vector<8x1xbf16> to vector<8x32xbf16>
    %16 = vector.broadcast %14 : vector<1x32xbf16> to vector<8x32xbf16>
    %17 = arith.mulf %15, %16 : vector<8x32xbf16>
    %18 = arith.addf %12, %17 : vector<8x32xbf16>
    %19 = vector.extract_strided_slice %7 {offsets = [0, 2], sizes = [8, 1], strides = [1, 1]} : vector<8x4xbf16> to vector<8x1xbf16>
    %20 = vector.extract_strided_slice %1 {offsets = [2, 0], sizes = [1, 32], strides = [1, 1]} : vector<4x32xbf16> to vector<1x32xbf16>
    %21 = vector.broadcast %19 : vector<8x1xbf16> to vector<8x32xbf16>
    %22 = vector.broadcast %20 : vector<1x32xbf16> to vector<8x32xbf16>
    %23 = arith.mulf %21, %22 : vector<8x32xbf16>
    %24 = arith.addf %18, %23 : vector<8x32xbf16>
    %25 = vector.extract_strided_slice %7 {offsets = [0, 3], sizes = [8, 1], strides = [1, 1]} : vector<8x4xbf16> to vector<8x1xbf16>
    %26 = vector.extract_strided_slice %1 {offsets = [3, 0], sizes = [1, 32], strides = [1, 1]} : vector<4x32xbf16> to vector<1x32xbf16>
    %27 = vector.broadcast %25 : vector<8x1xbf16> to vector<8x32xbf16>
    %28 = vector.broadcast %26 : vector<1x32xbf16> to vector<8x32xbf16>
    %29 = arith.mulf %27, %28 : vector<8x32xbf16>
    %30 = arith.addf %24, %29 : vector<8x32xbf16>
    %cst = arith.constant 0.000000e+00 : bf16
    %31 = vector.broadcast %cst : bf16 to vector<8x32xbf16>
    %32 = arith.maximumf %30, %31 : vector<8x32xbf16>
    %cst_6 = arith.constant dense<0.000000e+00> : vector<8x16xf32>
    %33 = tpu.matmul %32, %2, %cst_6 {dimension_numbers = #tpu.dot_dimension_numbers<[1], [0], [0], [1], [0, 0, 1, 1], [], []>} : vector<8x32xbf16>, vector<32x16xbf16>, vector<8x16xf32> -> vector<8x16xf32>
    %cst_7 = arith.constant 1.000000e+00 : f32
    %34 = vector.broadcast %cst_7 : f32 to vector<8x16xf32>
    %35 = arith.subf %34, %33 : vector<8x16xf32>
    %cst_8 = arith.constant 0.000000e+00 : f32
    %cst_9 = arith.constant 1.000000e+00 : f32
    %36 = vector.broadcast %cst_8 : f32 to vector<8x16xf32>
    %37 = arith.maximumf %36, %35 : vector<8x16xf32>
    %38 = vector.broadcast %cst_9 : f32 to vector<8x16xf32>
    %39 = arith.minimumf %38, %37 : vector<8x16xf32>
    %c0_10 = arith.constant 0 : index
    %c0_11 = arith.constant 0 : index
    %40 = vector.load %arg5[%c0_10, %c0_11] : memref<1x16xf32, #tpu.memory_space<vmem>>, vector<1x16xf32>
    %41 = vector.broadcast %40 : vector<1x16xf32> to vector<8x16xf32>
    %42 = arith.mulf %39, %41 : vector<8x16xf32>
    %cst_12 = arith.constant dense<0.000000e+00> : vector<8xf32>
    %43 = vector.multi_reduction <add>, %42, %cst_12 [1] : vector<8x16xf32> to vector<8xf32>
    %44 = vector.shape_cast %43 : vector<8xf32> to vector<8x1xf32>
    %cst_13 = arith.constant 0.000000e+00 : f32
    %cst_14 = arith.constant 1.000000e+00 : f32
    %45 = vector.broadcast %cst_13 : f32 to vector<8x1xf32>
    %46 = arith.maximumf %45, %44 : vector<8x1xf32>
    %47 = vector.broadcast %cst_14 : f32 to vector<8x1xf32>
    %48 = arith.minimumf %47, %46 : vector<8x1xf32>
    %c0_15 = arith.constant 0 : index
    %49 = arith.index_cast %4 : i32 to index
    %c0_16 = arith.constant 0 : index
    %50 = vector.load %arg6[%c0_15, %49, %c0_16] : memref<1x8x16xf32, #tpu.memory_space<vmem>>, vector<1x8x16xf32>
    %51 = vector.shape_cast %50 : vector<1x8x16xf32> to vector<8x16xf32>
    %52 = vector.shape_cast %39 : vector<8x16xf32> to vector<1x8x16xf32>
    tpu.vector_store %arg6[%c0_15, %49, %c0_16], %52 {strides = array<i32>} : memref<1x8x16xf32, #tpu.memory_space<vmem>>, vector<1x8x16xf32>,
    %c0_17 = arith.constant 0 : index
    %53 = arith.index_cast %4 : i32 to index
    %c0_18 = arith.constant 0 : index
    %54 = vector.load %arg7[%c0_17, %53, %c0_18] : memref<1x8x1xf32, #tpu.memory_space<vmem>>, vector<1x8x1xf32>
    %55 = vector.shape_cast %54 : vector<1x8x1xf32> to vector<8x1xf32>
    %56 = vector.shape_cast %48 : vector<8x1xf32> to vector<1x8x1xf32>
    tpu.vector_store %arg7[%c0_17, %53, %c0_18], %56 {strides = array<i32>} : memref<1x8x1xf32, #tpu.memory_space<vmem>>, vector<1x8x1xf32>,
    %c1_i32 = arith.constant 1 : i32
    return
  }
  func.func @transform_0(%arg0: i32, %arg1: i32) -> (i32, i32, i32) {
    %c0_i32 = arith.constant 0 : i32
    %c0_i32_0 = arith.constant 0 : i32
    return %arg0, %arg1, %c0_i32 : i32, i32, i32
  }
  func.func @transform_1(%arg0: i32, %arg1: i32) -> (i32, i32, i32) {
    %c0_i32 = arith.constant 0 : i32
    %c0_i32_0 = arith.constant 0 : i32
    %c0_i32_1 = arith.constant 0 : i32
    return %arg0, %c0_i32, %c0_i32_0 : i32, i32, i32
  }
  func.func @transform_2(%arg0: i32, %arg1: i32) -> (i32, i32) {
    %c0_i32 = arith.constant 0 : i32
    %c0_i32_0 = arith.constant 0 : i32
    %c0_i32_1 = arith.constant 0 : i32
    return %c0_i32, %c0_i32_0 : i32, i32
  }
  func.func @transform_3(%arg0: i32, %arg1: i32) -> (i32, i32) {
    %c0_i32 = arith.constant 0 : i32
    %c0_i32_0 = arith.constant 0 : i32
    %c0_i32_1 = arith.constant 0 : i32
    return %c0_i32, %c0_i32_0 : i32, i32
  }
  func.func @transform_4(%arg0: i32, %arg1: i32) -> (i32, i32, i32) {
    %c0_i32 = arith.constant 0 : i32
    %c0_i32_0 = arith.constant 0 : i32
    return %arg0, %arg1, %c0_i32 : i32, i32, i32
  }
  func.func @transform_5(%arg0: i32, %arg1: i32) -> (i32, i32, i32) {
    %c0_i32 = arith.constant 0 : i32
    %c0_i32_0 = arith.constant 0 : i32
    return %arg0, %arg1, %c0_i32 : i32, i32, i32
  }
}

</mosaic_0001>

<bundles_post_ra>
// kernel: tpu_custom_call.1
= control target key start
LH: loop header
LB: loop body
LE: loop exit
PB: predicated region body
PF: predicated region fallthrough
CT: control target
= control target key end

     0   :  { %11 = vsyncpa [#allocation3], 0  ;;  %s919_s0 = inlined_call_operand.vmem [shape: bf16[2,8,4], index: 0, kind: input, shape index: {}]   ;;  %s920_s1 = inlined_call_operand.vmem [shape: bf16[2,4,32], index: 1, kind: input, shape index: {}]   ;;  %s921_s2 = inlined_call_operand.vmem [shape: bf16[32,16], index: 2, kind: input, shape index: {}]   ;;  %s922_s3 = inlined_call_operand.vmem [shape: f32[1,16], index: 3, kind: input, shape index: {}]   ;;  %s923_s4 = inlined_call_operand.hbm [shape: f32[2,8,16], index: 4, kind: output, shape index: {0}]   ;;  %s924_s5 = inlined_call_operand.vmem [shape: f32[2,8,1], index: 5, kind: output, shape index: {1}]  }
   0x1   :  { %13 = vsyncpa [#allocation3 + $0x1], 0  ;;  %s793_s18 = smov 0   ;;  %s795_s19 = smov 0  }
   0x2   :  { %s797_s20 = smov 0   ;;  %s799_s21 = smov 0  }
   0x3   :  { %s801_s22 = smov 0   ;;  %s803_s23 = smov 0  }
   0x4 LB: > { %s578_s24 = sadd.s32 4294967295, %s753_s23   ;;  %s579_s25 = sadd.s32 4294967294, %s753_s23   ;;  %s753_s23 = sphi %s803_s23, %s19_s23   ;;  %s749_s22 = sphi %s801_s22, %s931_s22   ;;  %s745_s21 = sphi %s799_s21, %s930_s21   ;;  %s741_s20 = sphi %s797_s20, %s929_s20   ;;  %s737_s19 = sphi %s795_s19, %s928_s19   ;;  %s733_s18 = sphi %s793_s18, %s927_s18  }
   0x5   : > { %s31_s26 = sadd.s32 1, %s749_s22  ;;  %s136_s27 = sadd.s32 1, %s741_s20 }
   0x6   : > { %p33_p0 = scmp.ge.s32.totalorder %s31_s26, 2  ;;  %p146_p1 = scmp.ne.s32.totalorder %s741_s20, %s737_s19 }
   0x7   : > { %p147_p2 = scmp.eq.s32.totalorder %s578_s24, 1  ;;  %p152_p3 = scmp.ne.s32.totalorder %s737_s19, %s733_s18 }
   0x8   : > { %s933_s26 = smov (%p33_p0, %s31_s26), 0  ;;  %p153_p5 = scmp.eq.s32.totalorder %s579_s25, 1 }
   0x9   : > { %p833_p4 = por %p147_p2, %p146_p1  ;;  %s131_s29 = ssub.s32 %s749_s22, %s933_s26 }
   0xa   : > { %p582_p6 = scmp.ge.s32.totalorder %s753_s23, 1  ;;  %p134_p7 = scmp.eq.s32.totalorder %s131_s29, 0 }
   0xb   : > { %p840_p8 = por %p153_p5, %p152_p3  ;;  %p222_p9 = scmp.lt.s32.totalorder %s753_s23, 3 }
   0xc   : > { %s846_s6 = scalar_select %p134_p7, %s741_s20, %s136_s27  }
   0xd   : > { %p223_p10 = pnand %p582_p6, %p222_p9 }
   0xe   : > { %p263_p11 = scmp.lt.s32.totalorder (!%p223_p10), %s745_s21, 1  ;;  %v755_v0 = vmov (!%p223_p10), 0   ;;  %v756_v1 = vmov (!%p223_p10), 2   ;;  %v757_v3 = vmov (!%p223_p10), 1   ;;  %v758_v4 = vmov (!%p223_p10), 3   ;;  %v673_v5 = vld [vmem:[%s921_s2] sm:$0xff] (!%p223_p10)  }
   0xf   : > { %226 = sbr.rel (%p223_p10) target bundleno = 540 (0x21c), region = 36  ;;  %668 = vset.pattern.permute.xlu0 (!%p223_p10), %v755_v0  ;;  %670 = vset.pattern.permute.xlu1 (!%p223_p10), %v756_v1  ;;  %v759_v6 = vmov (!%p223_p10), 0.0   ;;  %v674_v7 = vld [vmem:[%s921_s2 + $0x8] sm:$0xff] (!%p223_p10)   ;;  %vm760_vm0 = vmmov (!%p223_p10), 0   ;;  %v761_v8 = vmov (!%p223_p10), 839922192   ;;  %v296_v10 = vlaneseq (!%p223_p10) }
  0x10   : > { %598 = vmatprep.subr.bf16.mxu0 (!%p223_p10), %v759_v6  ;;  %602 = vmatprep.mubr.msk.bf16.mxu0 (!%p223_p10), %vm760_vm0, %v759_v6  ;;  %v294_v9 = vunpack.c.l.s4 (!%p223_p10), %v761_v8  ;;  %vm375_vm1 = vcmask (!%p223_p10), 261120   ;;  %s251_s27 = sand.u32 (!%p223_p10), 1, %s737_s19   ;;  %v590_v46 = vld [vmem:[%s922_s3] ss:$0 sm:$0xff] (!%p223_p10)  ;;  %vm430_vm2 = vcmask (!%p223_p10), 130048   ;;  %s762_s24 = smov (!%p223_p10), [#allocation2]  }
  0x11   : > { %599 = vmatpush3.bf16.msra.mxu0 (!%p223_p10), %v673_v5  ;;  %v297_v13 = vshrl.u32 (!%p223_p10), %v296_v10, 7  ;;  %s583_s29 = sshll.u32 (!%p223_p10), %s251_s27, 3 }
  0x12   : > { %600 = vmatprep.subr.bf16.mxu0 (!%p223_p10), %v759_v6  ;;  %v295_v12 = vunpack.c.0.s8 (!%p223_p10), %v294_v9  ;;  %s253_s10 = scalar_lea.vmem (!%p223_p10), [#allocation2], %s583_s29 }
  0x13   : > { %v305_v17 = vsub.s32 (!%p223_p10), 0, %v297_v13  ;;  %v341_v21 = vsub.s32 (!%p223_p10), 1, %v297_v13  ;;  %s461_s12 = sshll.u32 (!%p223_p10), %s253_s10, 4  ;;  %s462_s12 = int_to_ptr.vmem [resolvable:$true] %s461_s12 }
  0x14   : > { %v298_v15 = vsub.s32 (!%p223_p10), %v295_v12, %v297_v13  ;;  %s675_s17 = scalar_lea.vmem (!%p223_p10), %s462_s12, 128 }
  0x15   : > { %601 = vmatpush3.bf16.msra.mxu0 (!%p223_p10), %v674_v7  ;;  %p676_p12 = scmp.ne.s32.totalorder (!%p223_p10), %s462_s12, %s675_s17 }
  0x16   : > { %s850_s7 = scalar_select %p263_p11, %s745_s21, 1 }
  0x17   : > { %p677_p13 = pnand %p676_p12, %p833_p4 }
  0x18   : > { %s584_s8 = sshll.u32 %s850_s7, 2  ;;  %s585_s16 = sshll.u32 %s850_s7, 1 }
  0x19   : > { %s269_s11 = scalar_lea.vmem %s919_s0, %s584_s8  ;;  %s273_s25 = scalar_lea.vmem %s920_s1, %s585_s16 }
  0x1a   : > { %v287_v2 = vld [vmem:[%s269_s11] sm:$0xf]  ;;  %s592_s11 = sshll.u32 %s745_s21, 7  ;;  %s440_s16 = scalar_lea.sflag [#allocation3], %s251_s27 }
  0x1b   : > { %290 = vperm.xlu0 %668, %v287_v2   ;;  %329 = vperm.xlu1 %670, %v287_v2   ;;  %v282_v11 = vld [vmem:[%s273_s25] sm:$0x3]  ;;  %s874_s15 = scalar_lea.hbm %s923_s4, %s592_s11  ;;  %p678_p0 = pneg %p677_p13 }
  0x1c   : > { %v319_v14 = vshrl.u32 %v282_v11, 16  ;;  %v301_v16 = vpack.i.b16 %v282_v11, %v282_v11  ;;  %s679_s25 = sshll.u32 %s762_s24, 4  ;;  %s680_s25 = int_to_ptr.vmem [resolvable:$false] %s679_s25 }
  0x1d   : > { %s681_s29 = scalar_lea.vmem %s680_s25, 256  ;;  %p682_p1 = scmp.lt.s32.totalorder %s462_s12, %s680_s25 }
  0x1e   : > { %v320_v20 = vpack.i.b16 %v319_v14, %v319_v14  ;;  %v306_v22 = vrot.slane %v301_v16, %v305_v17  ;;  %v342_v25 = vrot.slane %v301_v16, %v341_v21  ;;  %p683_p2 = scmp.lt.s32.totalorder %s681_s29, %s675_s17 }
  0x1f   : > { %669 = vset.pattern.permute.xlu0 %v757_v3  ;;  %671 = vset.pattern.permute.xlu1 %v758_v4 }
  0x20   : > { %309 = vperm.xlu0 %669, %v287_v2   ;;  %346 = vperm.xlu1 %671, %v287_v2   ;;  %v325_v24 = vrot.slane %v320_v20, %v305_v17  ;;  %v359_v30 = vrot.slane %v320_v20, %v341_v21  ;;  %p684_p3 = por %p683_p2, %p682_p1 }
  0x22   : > { %p685_p5 = pnand %p684_p3, %p678_p0 }
  0x24   : > { %672 = vset.pattern.permute.xlu0 %v758_v4 }
  0x9a   : > { %v291_v18 = vpop.permute.xlu0 %290  ;;  %v330_v19 = vpop.permute.xlu1 %329 }
  0x9b   : > { %v299_v23 = vrot.slane %v291_v18, %v298_v15  ;;  %v338_v28 = vrot.slane %v330_v19, %v298_v15 }
  0x9d   : > { %v307_v32 = vmul.bf16 %v306_v22, %v299_v23  ;;  %v343_v34 = vmul.bf16 %v342_v25, %v338_v28 }
  0x9f   : > { %v310_v26 = vpop.permute.xlu0 %309  ;;  %v347_v27 = vpop.permute.xlu1 %346 }
  0xa0   : > { %v318_v29 = vrot.slane %v310_v26, %v298_v15  ;;  %v355_v31 = vrot.slane %v347_v27, %v298_v15 }
  0xa2   : > { %v326_v33 = vmul.bf16 %v325_v24, %v318_v29  ;;  %v360_v36 = vmul.bf16 %v359_v30, %v355_v31 }
  0xa4   : > { %v327_v35 = vadd.bf16 %v326_v33, %v307_v32 }
  0xa6   : > { %v344_v37 = vadd.bf16 %v343_v34, %v327_v35 }
  0xa8   : > { %v361_v38 = vadd.bf16 %v360_v36, %v344_v37 }
  0xaa   : > { %v362_v39 = vmax.bf16 %v755_v0, %v361_v38 }
  0xac   : > { %603 = vmatmul.mubr.msk.bf16.vlgmr.msra.gmra.mrb[0].mxu0 %vm375_vm1, %v362_v39 }
 0x17f   : > { %v413_v40 = vpop.f32.mrb[0].mxu0 }
 0x180   : > { %v419_v41 = vsub.f32 1.0, %v413_v40  ;;  %v604_v42 = vpop.f32.mrb[1].mxu0 }
 0x181   : > { %v416_v43 = vpop.f32.mrb[2].mxu0 }
 0x182   : > { %v420_v44 = vmax.f32 %v419_v41, 0.0  ;;  %v605_v45 = vpop.f32.mrb[3].mxu0 }
 0x184   : > { %v421_v47 = vmin.f32 %v420_v44, 1.0 }
 0x186   : > { %v429_v48 = vmul.f32 %v590_v46, %v421_v47  ;;  %436 = vst.msk [vmem:[%s253_s10] sm:$0xff] %vm430_vm2, %v421_v47 }
 0x188   : > { %v431_v49 = vsel %vm430_vm2, %v429_v48, 0.0 }
 0x189   : > { %432 = vadd.xlane.f32.xlu1 %v431_v49 }
 0x18a   : > { %688 = shalt.err (!%p685_p5)
}
 0x18b   : > { %s689_s21 = scalar_lea.hbm %s874_s15, 128  ;;  %s693_s9 = scalar_lea.hbm %s923_s4, 256 }
 0x18c   : > { %p690_p6 = scmp.ne.s32.totalorder %s874_s15, %s689_s21  ;;  %p694_p10 = scmp.lt.u32.totalorder %s874_s15, %s923_s4 }
 0x18d   : > { %p695_p11 = scmp.lt.u32.totalorder %s693_s9, %s689_s21  ;;  %p697_p13 = scmp.lt.u32.totalorder %s689_s21, %s874_s15 }
 0x18e   : > { %p691_p7 = pnand %p690_p6, %p833_p4 }
 0x18f   : > { %p696_p12 = por %p695_p11, %p694_p10 }
 0x190   : > { %p692_p9 = pneg %p691_p7 }
 0x191   : > { %p698_p0 = por %p697_p13, %p696_p12 }
 0x193   : > { %p699_p1 = pnand %p698_p0, %p692_p9 }
 0x195   : > { %702 = shalt.err (!%p699_p1)
}
 0x196   : > { %606 = dma.vmem_to_hbm [thread:$0]  (%p833_p4), %s462_s12, 128, %s874_s15, %s440_s16   ;;  %vm437_vm3 = vcmask 7168  }
 0x197   : > { %s586_s13 = sshll.u32 %s850_s7, 3 }
 0x198   : > { %s280_s24 = scalar_lea.vmem %s924_s5, %s586_s13 }
 0x216   : > { %v433_v50 = vpop.xlane.xlu1 %432 }
 0x217   : > { %v434_v51 = vmax.f32 %v433_v50, 0.0 }
 0x219   : > { %v435_v52 = vmin.f32 %v434_v51, 1.0 }
 0x21b   : > { %438 = vst.msk [vmem:[%s280_s24] sm:$0xff] %vm437_vm3, %v435_v52 }
 0x21c PF: > { %p612_p2 = scmp.ge.s32.totalorder %s753_s23, 2  ;;  %s476_s25 = sand.u32 1, %s733_s18  }
 0x21d   : > { %s477_s28 = scalar_lea.sflag [#allocation3], %s476_s25 }
 0x21e   : > { %p609_p3 = pnand %p612_p2, %p840_p8 }
 0x220   : > { %728 = dma.done.wait (!%p609_p3), %s477_s28, 128  }
 0x221   : > { %730 = vsyncadd (!%p609_p3), %s477_s28, 4294967168  ;;  %s19_s23 = sadd.s32 1, %s753_s23   ;;  %s927_s18 = smov %s737_s19 }
 0x222   : > { %p16_p4 = scmp.ge.s32.totalorder %s19_s23, 4   ;;  %s928_s19 = smov %s741_s20 }
 0x223   : > { %s929_s20 = smov %s846_s6  ;;  %s930_s21 = smov %s749_s22 }
 0x224   : > { %s931_s22 = smov %s933_s26  ;;  %18 = sbr.rel (!%p16_p4) target bundleno = 4 (0x4), region = 86 }
 0x22b   :  { %492 = vsyncpa [#allocation3], 1 }
 0x22c   :  { %494 = vsyncpa [#allocation3 + $0x1], 1 }

</bundles_post_ra>
